<compile_context>
chip_gen: v5e
topology: v5e:2x2
jax: 0.10.0
libtpu: 0.0.40
codegen_flags: <defaults>
</compile_context>

<pallas_src>
import functools

import jax
import jax.numpy as jnp
from jax.experimental import pallas as pl
from jax.experimental.pallas import tpu as pltpu


def _round_up(v, m):
    return (v + m - 1) // m * m


def _fused_head_kernel(x_ref, w_ref, b_ref, scores_ref, bbox_ref):
    """[scores | bbox] = x @ W_fused + b_fused in one lane-padded MXU matmul.

    x_ref:      (TM, C)               native dtype (f32 or bf16), streamed
    w_ref:      (C, CLS_PAD+BBOX_PAD) bf16, resident across the grid
    b_ref:      (1, CLS_PAD+BBOX_PAD) f32, resident
    scores_ref: (TM, CLS_PAD)         f32
    bbox_ref:   (TM, BBOX_PAD)        f32
    """
    x = x_ref[...].astype(w_ref.dtype)  # cast in VMEM (no-op if x already bf16)
    acc = jnp.dot(x, w_ref[...], preferred_element_type=jnp.float32)
    acc = acc + b_ref[...]
    cls_pad = scores_ref.shape[-1]      # static, multiple of 128 -> lane-aligned split
    scores_ref[...] = acc[:, :cls_pad].astype(scores_ref.dtype)
    bbox_ref[...] = acc[:, cls_pad:].astype(bbox_ref.dtype)


def prepare_fused_params(w_cls, b_cls, w_bbox, b_bbox,
                         compute_dtype=jnp.bfloat16):
    """One-time parameter prep (do this OUTSIDE the per-call path).

    w_cls:  (num_classes, C)      b_cls:  (num_classes,)
    w_bbox: (4*num_classes, C)    b_bbox: (4*num_classes,)

    Returns:
      w_fused: (C, CLS_PAD+BBOX_PAD)  compute_dtype
               columns = [cls | zero | bbox | zero], each head lane-padded to 128
      b_fused: (1, CLS_PAD+BBOX_PAD)  float32
      num_classes, num_bbox, cls_pad, bbox_pad
    """
    num_classes, c = w_cls.shape
    num_bbox = w_bbox.shape[0]
    cls_pad = _round_up(num_classes, 128)
    bbox_pad = _round_up(num_bbox, 128)

    w = jnp.zeros((c, cls_pad + bbox_pad), jnp.float32)
    w = w.at[:, :num_classes].set(w_cls.T.astype(jnp.float32))
    w = w.at[:, cls_pad:cls_pad + num_bbox].set(w_bbox.T.astype(jnp.float32))
    w_fused = w.astype(compute_dtype)

    b = jnp.zeros((1, cls_pad + bbox_pad), jnp.float32)
    b = b.at[0, :num_classes].set(b_cls.astype(jnp.float32))
    b = b.at[0, cls_pad:cls_pad + num_bbox].set(b_bbox.astype(jnp.float32))
    return w_fused, b, num_classes, num_bbox, cls_pad, bbox_pad


@functools.partial(
    jax.jit,
    static_argnames=("num_classes", "num_bbox", "cls_pad", "bbox_pad"))
def fast_rcnn_predictor_fused(x, w_fused, b_fused, *, num_classes, num_bbox,
                              cls_pad, bbox_pad):
    """Pallas forward using pre-fused params.  Returns (scores, bbox_deltas)."""
    if x.ndim == 4:
        assert x.shape[2] == 1 and x.shape[3] == 1, "expected spatial dims [1, 1]"
    x2 = x.reshape(x.shape[0], -1)                     # flatten(1)
    n, c = x2.shape
    out_pad = cls_pad + bbox_pad
    assert w_fused.shape == (c, out_pad)

    x_bytes = jnp.dtype(x2.dtype).itemsize
    w_bytes = jnp.dtype(w_fused.dtype).itemsize
    out_dtype = x2.dtype
    out_bytes = jnp.dtype(out_dtype).itemsize

    # ---- Row tile selection ------------------------------------------------
    # Per-row VMEM cost: double-buffered x tile + two double-buffered output
    # tiles.  Resident weight/bias are counted once (conservatively x2 for the
    # default pipelining buffers).  Budget works for v7x (64 MiB) and is far
    # below v5e/v6e's 128 MiB, while still allowing tm up to 2048.
    weight_vmem = 2 * (c * out_pad * w_bytes + out_pad * 4)
    per_row = 2 * (c * x_bytes + out_pad * out_bytes)
    budget = 36 * 2**20
    tm_cap = max(8, min(2048, (budget - weight_vmem) // per_row // 8 * 8))
    # >= 2 row blocks whenever n > 8 so both v7x TensorCores get work.
    tm = min(tm_cap, max(8, _round_up(pl.cdiv(n, 2), 8)))
    grid = (pl.cdiv(n, tm),)                           # ragged last block is masked

    vmem_needed = weight_vmem + tm * per_row + tm * out_pad * 4  # + f32 acc temp
    vmem_limit = int(min(48 * 2**20, vmem_needed + (6 << 20)))

    cost = pl.CostEstimate(
        flops=2 * n * c * out_pad,
        transcendentals=0,
        bytes_accessed=(n * c * x_bytes + c * out_pad * w_bytes
                        + out_pad * 4 + n * out_pad * out_bytes),
    )

    scores_p, bbox_p = pl.pallas_call(
        _fused_head_kernel,
        out_shape=(jax.ShapeDtypeStruct((n, cls_pad), out_dtype),
                   jax.ShapeDtypeStruct((n, bbox_pad), out_dtype)),
        grid=grid,
        in_specs=[
            pl.BlockSpec((tm, c), lambda i: (i, 0)),         # x: streamed tiles
            pl.BlockSpec((c, out_pad), lambda i: (0, 0)),    # weights: resident
            pl.BlockSpec((1, out_pad), lambda i: (0, 0)),    # bias: resident
        ],
        out_specs=(
            pl.BlockSpec((tm, cls_pad), lambda i: (i, 0)),
            pl.BlockSpec((tm, bbox_pad), lambda i: (i, 0)),
        ),
        compiler_params=pltpu.CompilerParams(
            dimension_semantics=("parallel",),
            vmem_limit_bytes=vmem_limit,
        ),
        cost_estimate=cost,
    )(x2, w_fused, b_fused)

    # Only a lane trim remains (rows are already exact); for consumers that can
    # work on the 128-padded widths directly, return scores_p / bbox_p instead.
    scores = scores_p[:, :num_classes]
    bbox_deltas = bbox_p[:, :num_bbox]
    return scores, bbox_deltas


def fast_rcnn_predictor(x, w_cls, b_cls, w_bbox, b_bbox,
                        compute_dtype=jnp.bfloat16):
    """Convenience wrapper matching the original (un-fused) parameter layout."""
    w_fused, b_fused, nc, nb, cp, bp = prepare_fused_params(
        w_cls, b_cls, w_bbox, b_bbox, compute_dtype)
    return fast_rcnn_predictor_fused(x, w_fused, b_fused, num_classes=nc,
                                     num_bbox=nb, cls_pad=cp, bbox_pad=bp)


def init_params(key, in_channels, num_classes, dtype=jnp.float32):
    """Deterministic nn.Linear-style init: U(-1/sqrt(fan_in), 1/sqrt(fan_in))."""
    k1, k2, k3, k4 = jax.random.split(key, 4)
    bound = 1.0 / jnp.sqrt(jnp.asarray(in_channels, dtype))
    w_cls = jax.random.uniform(k1, (num_classes, in_channels), dtype,
                               minval=-bound, maxval=bound)
    b_cls = jax.random.uniform(k2, (num_classes,), dtype,
                               minval=-bound, maxval=bound)
    w_bbox = jax.random.uniform(k3, (num_classes * 4, in_channels), dtype,
                                minval=-bound, maxval=bound)
    b_bbox = jax.random.uniform(k4, (num_classes * 4,), dtype,
                                minval=-bound, maxval=bound)
    return w_cls, b_cls, w_bbox, b_bbox


if __name__ == "__main__":
    in_channels = 32
    num_classes = 8
    batch = 4

    key = jax.random.PRNGKey(0)
    kx, kp = jax.random.split(key)
    # 4-D input path, as in roi-head usage: (N, C, 1, 1)
    x = jax.random.normal(kx, (batch, in_channels, 1, 1), jnp.float32)
    w_cls, b_cls, w_bbox, b_bbox = init_params(kp, in_channels, num_classes)

    # One-time param prep (transpose / concat / lane-pad / bf16 cast), then call.
    w_fused, b_fused, nc, nb, cp, bp = prepare_fused_params(
        w_cls, b_cls, w_bbox, b_bbox)
    scores, bbox_deltas = fast_rcnn_predictor_fused(
        x, w_fused, b_fused, num_classes=nc, num_bbox=nb, cls_pad=cp, bbox_pad=bp)
    scores = jax.block_until_ready(scores)
    bbox_deltas = jax.block_until_ready(bbox_deltas)

    # Reference in plain JAX with matching arithmetic (bf16 operands, f32 acc).
    x_flat = x.reshape(batch, -1)
    xb = x_flat.astype(jnp.bfloat16)
    ref_scores = jnp.dot(xb, w_cls.T.astype(jnp.bfloat16),
                         preferred_element_type=jnp.float32) + b_cls
    ref_bbox = jnp.dot(xb, w_bbox.T.astype(jnp.bfloat16),
                       preferred_element_type=jnp.float32) + b_bbox

    assert scores.shape == (batch, num_classes)
    assert bbox_deltas.shape == (batch, num_classes * 4)
    assert jnp.allclose(scores, ref_scores, atol=1e-3, rtol=1e-3)
    assert jnp.allclose(bbox_deltas, ref_bbox, atol=1e-3, rtol=1e-3)

    print("KERNEL_OK")
</pallas_src>

<mosaic_0001>
module attributes {stable_mosaic.version = 11 : i64} {
  func.func @_fused_head_kernel(%arg0: i32, %arg1: memref<8x32xf32, #tpu.memory_space<vmem>>, %arg2: memref<32x256xbf16, #tpu.memory_space<vmem>>, %arg3: memref<1x256xf32, #tpu.memory_space<vmem>>, %arg4: memref<8x128xf32, #tpu.memory_space<vmem>>, %arg5: memref<8x128xf32, #tpu.memory_space<vmem>>) attributes {dimension_semantics = [#tpu.dimension_semantics<parallel>], iteration_bounds = array<i64: 1>, scalar_prefetch = 0 : i64, scratch_operands = 0 : i64, tpu.core_type = #tpu.core_type<tc>, window_params = [{transform_indices = @transform_0, window_bounds = array<i64: 8, 32>}, {pipeline_mode = #tpu.pipeline_mode<synchronous>, transform_indices = @transform_1, window_bounds = array<i64: 32, 256>}, {pipeline_mode = #tpu.pipeline_mode<synchronous>, transform_indices = @transform_2, window_bounds = array<i64: 1, 256>}, {transform_indices = @transform_3, window_bounds = array<i64: 8, 128>}, {transform_indices = @transform_4, window_bounds = array<i64: 8, 128>}]} {
    %c0 = arith.constant 0 : index
    %c0_0 = arith.constant 0 : index
    %0 = vector.load %arg1[%c0, %c0_0] : memref<8x32xf32, #tpu.memory_space<vmem>>, vector<8x32xf32>
    %1 = arith.truncf %0 : vector<8x32xf32> to vector<8x32xbf16>
    %c0_1 = arith.constant 0 : index
    %c0_2 = arith.constant 0 : index
    %2 = vector.load %arg2[%c0_1, %c0_2] : memref<32x256xbf16, #tpu.memory_space<vmem>>, vector<32x256xbf16>
    %cst = arith.constant dense<0.000000e+00> : vector<8x256xf32>
    %3 = tpu.matmul %1, %2, %cst {dimension_numbers = #tpu.dot_dimension_numbers<[1], [0], [0], [1], [0, 0, 1, 1], [], []>} : vector<8x32xbf16>, vector<32x256xbf16>, vector<8x256xf32> -> vector<8x256xf32>
    %c0_3 = arith.constant 0 : index
    %c0_4 = arith.constant 0 : index
    %4 = vector.load %arg3[%c0_3, %c0_4] : memref<1x256xf32, #tpu.memory_space<vmem>>, vector<1x256xf32>
    %5 = vector.broadcast %4 : vector<1x256xf32> to vector<8x256xf32>
    %6 = arith.addf %3, %5 : vector<8x256xf32>
    %7 = vector.extract_strided_slice %6 {offsets = [0, 0], sizes = [8, 128], strides = [1, 1]} : vector<8x256xf32> to vector<8x128xf32>
    %c0_5 = arith.constant 0 : index
    %c0_6 = arith.constant 0 : index
    %8 = vector.load %arg4[%c0_5, %c0_6] : memref<8x128xf32, #tpu.memory_space<vmem>>, vector<8x128xf32>
    tpu.vector_store %arg4[%c0_5, %c0_6], %7 {strides = array<i32>} : memref<8x128xf32, #tpu.memory_space<vmem>>, vector<8x128xf32>,
    %9 = vector.extract_strided_slice %6 {offsets = [0, 128], sizes = [8, 128], strides = [1, 1]} : vector<8x256xf32> to vector<8x128xf32>
    %c0_7 = arith.constant 0 : index
    %c0_8 = arith.constant 0 : index
    %10 = vector.load %arg5[%c0_7, %c0_8] : memref<8x128xf32, #tpu.memory_space<vmem>>, vector<8x128xf32>
    tpu.vector_store %arg5[%c0_7, %c0_8], %9 {strides = array<i32>} : memref<8x128xf32, #tpu.memory_space<vmem>>, vector<8x128xf32>,
    return
  }
  func.func @transform_0(%arg0: i32) -> (i32, i32) {
    %c0_i32 = arith.constant 0 : i32
    %c0_i32_0 = arith.constant 0 : i32
    return %arg0, %c0_i32 : i32, i32
  }
  func.func @transform_1(%arg0: i32) -> (i32, i32) {
    %c0_i32 = arith.constant 0 : i32
    %c0_i32_0 = arith.constant 0 : i32
    %c0_i32_1 = arith.constant 0 : i32
    return %c0_i32, %c0_i32_0 : i32, i32
  }
  func.func @transform_2(%arg0: i32) -> (i32, i32) {
    %c0_i32 = arith.constant 0 : i32
    %c0_i32_0 = arith.constant 0 : i32
    %c0_i32_1 = arith.constant 0 : i32
    return %c0_i32, %c0_i32_0 : i32, i32
  }
  func.func @transform_3(%arg0: i32) -> (i32, i32) {
    %c0_i32 = arith.constant 0 : i32
    %c0_i32_0 = arith.constant 0 : i32
    return %arg0, %c0_i32 : i32, i32
  }
  func.func @transform_4(%arg0: i32) -> (i32, i32) {
    %c0_i32 = arith.constant 0 : i32
    %c0_i32_0 = arith.constant 0 : i32
    return %arg0, %c0_i32 : i32, i32
  }
}

</mosaic_0001>

<bundles_post_ra>
// kernel: fast_rcnn_predictor_fused.1
= control target key start
LH: loop header
LB: loop body
LE: loop exit
PB: predicated region body
PF: predicated region fallthrough
CT: control target
= control target key end

     0   :  { %10 = vsyncpa [#allocation3], 0  ;;  %s344_s0 = inlined_call_operand.hbm [shape: f32[4,32], index: 0, kind: input, shape index: {}]   ;;  %s345_s1 = inlined_call_operand.hbm [shape: bf16[32,256], index: 1, kind: input, shape index: {}]   ;;  %s346_s2 = inlined_call_operand.vmem [shape: f32[1,256], index: 2, kind: input, shape index: {}]   ;;  %s347_s3 = inlined_call_operand.hbm [shape: f32[4,128], index: 3, kind: output, shape index: {0}]   ;;  %s348_s4 = inlined_call_operand.hbm [shape: f32[4,128], index: 4, kind: output, shape index: {1}]  }
   0x1   :  { %11 = vsyncpa [#allocation6], 0 }
   0x2   :  { %12 = vsyncpa [#allocation4], 0 }
   0x3   :  { %13 = vsyncpa [#allocation9], 0 }
   0x4   :  { %17 = vsyncadd [#allocation3], 64  ;;  %s18_s17 = sshll.u32 %s344_s0, 4  ;;  %s287_s18 = smov [#allocation2]   ;;  %s19_s17 = int_to_ptr.hbm [resolvable:$true] %s18_s17 }
   0x5   :  { %s20_s19 = sshll.u32 %s287_s18, 4  ;;  %s31_s22 = sshll.u32 %s345_s1, 4  ;;  %s21_s19 = int_to_ptr.vmem [resolvable:$true] %s20_s19  ;;  %s32_s22 = int_to_ptr.hbm [resolvable:$true] %s31_s22 }
   0x6   :  { %s288_s23 = smov 64   ;;  %s289_s24 = smov 4  }
   0x7   :  { %26 = dma.hbm_to_vmem [thread:$0]  %s19_s17, 64, %s21_s19, [#allocation3], %s288_s23, %s288_s23, %s289_s24  }
   0x8   :  { %s290_s25 = smov [#allocation5]   ;;  %s291_s27 = smov 128  }
   0x9   :  { %s33_s26 = sshll.u32 %s290_s25, 4  ;;  %s292_s0 = smov 8   ;;  %s34_s26 = int_to_ptr.vmem [resolvable:$true] %s33_s26 }
   0xa   :  { %39 = dma.hbm_to_vmem [thread:$0]  %s32_s22, 512, %s34_s26, [#allocation6], %s291_s27, %s291_s27, %s292_s0  }
   0xb   :  { %279 = dma.done.wait [#allocation3], 128  }
   0xc   :  { %280 = vsyncadd [#allocation3], 4294967168 }
   0xd   :  { %281 = dma.done.wait [#allocation6], 512  }
   0xe   :  { %282 = vsyncadd [#allocation6], 4294966784  ;;  %v163_v0 = vld [vmem:[#allocation5 + $0x10] sm:$0xf]  ;;  %v174_v1 = vld [vmem:[#allocation5 + $0x14] sm:$0xf0] }
   0xf   :  { %v173_v2 = vld [vmem:[#allocation5 + $0x14] sm:$0xf]  ;;  %v164_v3 = vor.u32 %v174_v1, %v163_v0  ;;  %v165_v4 = vld [vmem:[#allocation5 + $0x18] sm:$0xf0]  ;;  %v155_v5 = vld [vmem:[#allocation5] sm:$0xf] }
  0x10   :  { %v172_v6 = vld [vmem:[#allocation5 + $0x4] sm:$0xf0]  ;;  %v168_v7 = vor.u32 %v173_v2, %v165_v4  ;;  %v171_v8 = vld [vmem:[#allocation5 + $0x4] sm:$0xf]  ;;  %v157_v9 = vld [vmem:[#allocation5 + $0x8] sm:$0xf0] }
  0x11   :  { %93 = vmatpush.bf16.msra.mxu0 %v164_v3  ;;  %v156_v10 = vor.u32 %v172_v6, %v155_v5  ;;  %v51_v11 = vld [vmem:[#allocation2] sm:$0xff]  ;;  %v160_v12 = vor.u32 %v171_v8, %v157_v9  ;;  %vm83_vm0 = vcmask 261120  }
  0x12   :  { %106 = vmatpush.bf16.msra.mxu1 %v168_v7  ;;  %v52_v13 = vpack.c.bf16 %v51_v11, %v51_v11  ;;  %v57_v14 = vld [vmem:[%s346_s2] sm:$0x3] }
  0x13   :  { %v59_v15 = vperm.slane %v57_v14, 0  ;;  %v60_v16 = vperm.slane %v57_v14, 1 }
  0x15   :  { %94 = vmatpush.bf16.msra.mxu0 %v156_v10 }
  0x16   :  { %107 = vmatpush.bf16.msra.mxu1 %v160_v12 }
  0x18   :  { %169 = vmatmul.msk.bf16.vlgmr.msra.gmra.mxu0 %vm83_vm0, %v52_v13 }
  0x19   :  { %170 = vmatmul.msk.bf16.vlgmr.msra.gmra.mxu1 %vm83_vm0, %v52_v13 }
  0x95   :  { %v96_v17 = vpop.f32.mrf.mxu0 }
  0x96   :  { %v97_v18 = vadd.f32 %v96_v17, %v59_v15  ;;  %v109_v19 = vpop.f32.mrf.mxu1 }
  0x97   :  { %v110_v20 = vadd.f32 %v109_v19, %v60_v16 }
  0x98   :  { %113 = vst [vmem:[#allocation7] sm:$0xff] %v97_v18 }
  0x99   :  { %114 = vst [vmem:[#allocation8] sm:$0xff] %v110_v20 }
  0x9d   :  { %v98_v21 = vpop.f32.mrf.mxu0 }
  0x9e   :  { %v111_v22 = vpop.f32.mrf.mxu1 }
  0x9f   :  { %118 = vsyncadd [#allocation4], 64  ;;  %s121_s5 = sshll.u32 %s347_s3, 4  ;;  %s293_s6 = smov [#allocation7]   ;;  %s122_s5 = int_to_ptr.hbm [resolvable:$true] %s121_s5 }
  0xa0   :  { %s119_s7 = sshll.u32 %s293_s6, 4  ;;  %s120_s7 = int_to_ptr.vmem [resolvable:$true] %s119_s7 }
  0xa1   :  { %127 = dma.vmem_to_hbm [thread:$0]  %s120_s7, 64, %s122_s5, [#allocation4], %s288_s23, %s288_s23, %s289_s24  }
  0xa2   :  { %131 = vsyncadd [#allocation9], 64  ;;  %s134_s9 = sshll.u32 %s348_s4, 4  ;;  %s294_s10 = smov [#allocation8]   ;;  %s135_s9 = int_to_ptr.hbm [resolvable:$true] %s134_s9 }
  0xa3   :  { %s132_s11 = sshll.u32 %s294_s10, 4  ;;  %s133_s11 = int_to_ptr.vmem [resolvable:$true] %s132_s11 }
  0xa4   :  { %140 = dma.vmem_to_hbm [thread:$0]  %s133_s11, 64, %s135_s9, [#allocation9], %s288_s23, %s288_s23, %s289_s24  }
  0xa5   :  { %283 = dma.done.wait [#allocation4], 128  }
  0xa6   :  { %284 = vsyncadd [#allocation4], 4294967168 }
  0xa7   :  { %285 = dma.done.wait [#allocation9], 128  }
  0xa8   :  { %286 = vsyncadd [#allocation9], 4294967168 }
  0xa9   :  { %149 = vsyncpa [#allocation3], 1 }
  0xaa   :  { %150 = vsyncpa [#allocation6], 1 }
  0xab   :  { %151 = vsyncpa [#allocation4], 1 }
  0xac   :  { %152 = vsyncpa [#allocation9], 1 }

</bundles_post_ra>
